<compile_context>
chip_gen: v7x
topology: tpu7x:2x2x1
jax: 0.10.0
libtpu: 0.0.40
codegen_flags: <defaults>
</compile_context>

<pallas_src>
import functools

import jax
import jax.numpy as jnp
from jax import lax
from jax.experimental import pallas as pl
from jax.experimental.pallas import tpu as pltpu


def _pow(r, order):
    """r ** order for a static Python scalar `order` (r >= 0 after relu)."""
    if isinstance(order, int):
        # Static integer exponent -> repeated VPU multiplies.
        return lax.integer_pow(r, order)
    if isinstance(order, float) and order > 0 and (order * 2.0).is_integer():
        # Positive half-integer: integer_pow * sqrt avoids the exp/log path.
        k = int(order)
        out = lax.integer_pow(r, k)
        if order - k:
            out = out * jnp.sqrt(r)
        return out
    if isinstance(order, (int, float)) and order > 0:
        # Generic positive exponent: guard r == 0 so exp(order*log(0)) NaN
        # never reaches the output (torch gives exactly 0 there).
        return jnp.where(r > 0, r ** order, jnp.zeros_like(r))
    # Negative / other exponents: compute directly (0**neg -> inf like torch).
    return r ** order


def _sin_kernel(order, x_ref, o_ref):
    x = x_ref[...]
    r = jnp.maximum(x, jnp.zeros_like(x))      # relu, on the VPU
    o_ref[...] = _pow(r, order)


def _round_up(a, b):
    return ((a + b - 1) // b) * b


def _chip_params():
    """Per-chip block byte budget / VMEM limit / minimum grid steps."""
    kind = ""
    try:
        kind = jax.devices()[0].device_kind.lower()
    except Exception:
        pass
    if "v7" in kind:
        # 3.2 TB/s HBM: per-step overhead is relatively expensive -> 8 MiB
        # blocks (32 MiB double-buffered in+out, fits 64 MiB VMEM with a
        # 48 MiB scoped limit); >=2 grid steps so both TensorCores work.
        return {"block_bytes": 8 << 20, "vmem_limit": 48 << 20, "min_grid": 2}
    if "v6" in kind:
        # 4 MiB blocks -> 16 MiB total, under the 32 MiB default scoped limit.
        return {"block_bytes": 4 << 20, "vmem_limit": None, "min_grid": 1}
    # v5e / unknown: 2 MiB blocks -> 8 MiB total, under the 16 MiB default.
    return {"block_bytes": 2 << 20, "vmem_limit": None, "min_grid": 1}


def _sin_2d(x2d, order, block_bytes, vmem_limit, min_grid, donate=False):
    """Run the elementwise kernel over a lane-dense (rows, width) slab."""
    rows, width = x2d.shape
    dtype = x2d.dtype
    itemsize = jnp.dtype(dtype).itemsize

    # Byte-budgeted block: block bytes stay ~constant regardless of width and
    # dtype (so bf16/fp8 inputs and the width=128/256 fallbacks don't shrink).
    block_rows = max(8, (block_bytes // (width * itemsize)) // 8 * 8)

    if rows <= 8:
        tile_rows = rows                               # full-extent, grid of 1
    elif min_grid >= 2 and rows <= min_grid * block_rows:
        # Guarantee >=2 grid steps so both v7x TensorCores participate.
        tile_rows = max(8, _round_up(pl.cdiv(rows, min_grid), 8))
    elif rows <= block_rows:
        tile_rows = rows                               # full-extent, grid of 1
    else:
        tile_rows = block_rows                         # multiple of 8
    grid = (pl.cdiv(rows, tile_rows),)

    cparams = {"dimension_semantics": ("parallel",)}
    if vmem_limit is not None:
        cparams["vmem_limit_bytes"] = vmem_limit

    extra = {}
    if donate:
        extra["input_output_aliases"] = {0: 0}

    return pl.pallas_call(
        functools.partial(_sin_kernel, order),
        out_shape=jax.ShapeDtypeStruct((rows, width), dtype),
        grid_spec=pltpu.PrefetchScalarGridSpec(
            num_scalar_prefetch=0,
            grid=grid,
            in_specs=[pl.BlockSpec((tile_rows, width), lambda i: (i, 0))],
            out_specs=pl.BlockSpec((tile_rows, width), lambda i: (i, 0)),
        ),
        compiler_params=pltpu.CompilerParams(**cparams),
        **extra,
    )(x2d)


def sin_forward(x, order, *, donate=False):
    """Computes relu(x) ** order with a Pallas TPU kernel.

    x:      any-shape float array (the module uses NCHW activations).
    order:  static Python scalar exponent (self.e in the PyTorch module).
    donate: set True only if the caller donates x (aliases output onto input).
    """
    orig_shape = x.shape
    n = x.size

    if n == 0:
        return x  # nothing to do; avoid a zero-size grid

    # Normalize a float-valued-but-integer exponent so we always take the
    # integer_pow (VPU-only) path.
    if isinstance(order, float) and float(order).is_integer():
        order = int(order)

    cfg = _chip_params()
    x_flat = x.reshape(-1)

    # Widest lane-dense width (multiple of 128) dividing n: the reshape is a
    # free bitcast and every store is a full, unmasked vst.
    width = None
    for w in (1024, 512, 256, 128):
        if n % w == 0:
            width = w
            break

    if width is not None:
        out2d = _sin_2d(x_flat.reshape(n // width, width), order,
                        cfg["block_bytes"], cfg["vmem_limit"],
                        cfg["min_grid"], donate=donate)
        return out2d.reshape(orig_shape)

    # Ragged size: kernel on the 128-aligned prefix, plain jnp on the <=127
    # element tail (no full-array pad copy, no extra HBM pass).
    n_main = (n // 128) * 128
    tail = x_flat[n_main:]
    tail_out = _pow(jnp.maximum(tail, jnp.zeros_like(tail)), order)
    if n_main == 0:
        return tail_out.reshape(orig_shape)

    width = 128
    for w in (1024, 512, 256):
        if n_main % w == 0:
            width = w
            break
    main_out = _sin_2d(x_flat[:n_main].reshape(n_main // width, width), order,
                       cfg["block_bytes"], cfg["vmem_limit"],
                       cfg["min_grid"], donate=False).reshape(-1)
    return jnp.concatenate([main_out, tail_out]).reshape(orig_shape)


def sin_reference(x, order):
    return jnp.maximum(x, 0.0) ** order


if __name__ == "__main__":
    order = 2  # self.e in SIN(order); deterministic, set in-script

    # Small NCHW activation: batch=2, channels=4, spatial=16x16.
    x = jax.random.normal(jax.random.PRNGKey(0), (2, 4, 16, 16),
                          dtype=jnp.float32)
    out = jax.block_until_ready(sin_forward(x, order))
    ref = sin_reference(x, order)
    assert out.shape == x.shape
    assert out.dtype == x.dtype
    assert jnp.allclose(out, ref, atol=1e-6, rtol=1e-6)

    # Larger activation: exercises the byte-budgeted multi-block / split-grid
    # path and the masked ragged last row-block.
    x_big = jax.random.normal(jax.random.PRNGKey(1), (8, 32, 56, 56),
                              dtype=jnp.float32)
    out_big = jax.block_until_ready(sin_forward(x_big, order))
    assert jnp.allclose(out_big, sin_reference(x_big, order),
                        atol=1e-6, rtol=1e-6)

    # Ragged element count (not a multiple of 128): prefix kernel + jnp tail.
    x_rag = jax.random.normal(jax.random.PRNGKey(2), (3, 5, 7, 11),
                              dtype=jnp.float32)
    out_rag = jax.block_until_ready(sin_forward(x_rag, order))
    assert jnp.allclose(out_rag, sin_reference(x_rag, order),
                        atol=1e-6, rtol=1e-6)

    print("KERNEL_OK")
</pallas_src>

<mosaic_0001>
module attributes {stable_mosaic.version = 11 : i64} {
  func.func @_sin_kernel(%arg0: i32, %arg1: memref<2x1024xf32, #tpu.memory_space<vmem>>, %arg2: memref<2x1024xf32, #tpu.memory_space<vmem>>) attributes {dimension_semantics = [#tpu.dimension_semantics<parallel>], iteration_bounds = array<i64: 1>, scalar_prefetch = 0 : i64, scratch_operands = 0 : i64, tpu.core_type = #tpu.core_type<tc>, window_params = [{transform_indices = @transform_0, window_bounds = array<i64: 2, 1024>}, {transform_indices = @transform_1, window_bounds = array<i64: 2, 1024>}]} {
    %c0 = arith.constant 0 : index
    %c0_0 = arith.constant 0 : index
    %0 = vector.load %arg1[%c0, %c0_0] : memref<2x1024xf32, #tpu.memory_space<vmem>>, vector<2x1024xf32>
    %cst = arith.constant 0.000000e+00 : f32
    %1 = vector.broadcast %cst : f32 to vector<2x1024xf32>
    %2 = arith.maximumf %0, %1 : vector<2x1024xf32>
    %3 = arith.mulf %2, %2 : vector<2x1024xf32>
    %c0_1 = arith.constant 0 : index
    %c0_2 = arith.constant 0 : index
    %4 = vector.load %arg2[%c0_1, %c0_2] : memref<2x1024xf32, #tpu.memory_space<vmem>>, vector<2x1024xf32>
    tpu.vector_store %arg2[%c0_1, %c0_2], %3 {strides = array<i32>} : memref<2x1024xf32, #tpu.memory_space<vmem>>, vector<2x1024xf32>,
    return
  }
  func.func @transform_0(%arg0: i32) -> (i32, i32) {
    %c0_i32 = arith.constant 0 : i32
    %c0_i32_0 = arith.constant 0 : i32
    return %arg0, %c0_i32 : i32, i32
  }
  func.func @transform_1(%arg0: i32) -> (i32, i32) {
    %c0_i32 = arith.constant 0 : i32
    %c0_i32_0 = arith.constant 0 : i32
    return %arg0, %c0_i32 : i32, i32
  }
}

</mosaic_0001>

<bundles_post_ra>
// kernel: tpu_custom_call.1
= control target key start
LH: loop header
LB: loop body
LE: loop exit
PB: predicated region body
PF: predicated region fallthrough
CT: control target
= control target key end

     0   :  { %6 = vsyncpa [#allocation3], 0  ;;  %s130_s0 = inlined_call_operand.hbm [shape: f32[2,1024], index: 0, kind: input, shape index: {}]   ;;  %s131_s1 = inlined_call_operand.hbm [shape: f32[2,1024], index: 1, kind: output, shape index: {}]  }
   0x1   :  { %7 = vsyncpa [#allocation4], 0  ;;  %s94_s6 = smov [#allocation2]   ;;  %s46_s10 = scalar_lea.hbm %s130_s0, 256 }
   0x2   :  { %s14_s7 = sshll.u32 %s94_s6, 4  ;;  %p47_p0 = scmp.ne.s32.totalorder %s130_s0, %s46_s10  ;;  %s15_s7 = int_to_ptr.vmem [resolvable:$true] %s14_s7 }
   0x3   :  { %p50_p1 = scmp.lt.u32.totalorder %s46_s10, %s130_s0 }
   0x5   :  { %p52_p2 = pnand %p50_p1, %p47_p0 }
   0x7   :  { %55 = shalt.err (!%p52_p2)
}
   0x8   :  { %s56_s15 = scalar_lea.vmem %s15_s7, 256  ;;  %p61_p4 = scmp.lt.s32.totalorder %s15_s7, %s15_s7 }
   0x9   :  { %p57_p3 = scmp.ne.s32.totalorder %s15_s7, %s56_s15  ;;  %p62_p5 = scmp.lt.s32.totalorder %s56_s15, %s56_s15 }
   0xb   :  { %p63_p6 = por %p62_p5, %p61_p4 }
   0xd   :  { %p64_p7 = pnand %p63_p6, %p57_p3 }
   0xf   :  { %67 = shalt.err (!%p64_p7)
}
  0x10   :  { %17 = dma.hbm_to_vmem [thread:$0]  %s130_s0, 256, %s15_s7, [#allocation3]  }
  0x11   :  { %90 = dma.done.wait [#allocation3], 256  }
  0x12   :  { %91 = vsyncadd [#allocation3], 4294967040  ;;  %v21_v0 = vld [vmem:[#allocation2] sm:$0xff]  ;;  %v22_v1 = vld [vmem:[#allocation2 + $0x8] sm:$0xff]  ;;  %s95_s18 = smov [#allocation5]  }
  0x13   :  { %s35_s19 = sshll.u32 %s95_s18, 4  ;;  %v23_v2 = vmax.f32 %v21_v0, 0.0  ;;  %v24_v3 = vmax.f32 %v22_v1, 0.0  ;;  %s36_s19 = int_to_ptr.vmem [resolvable:$true] %s35_s19 }
  0x14   :  { %s68_s20 = scalar_lea.vmem %s36_s19, 256  ;;  %p73_p9 = scmp.lt.s32.totalorder %s36_s19, %s36_s19 }
  0x15   :  { %v25_v4 = vmul.f32 %v23_v2, %v23_v2  ;;  %v26_v5 = vmul.f32 %v24_v3, %v24_v3  ;;  %p69_p8 = scmp.ne.s32.totalorder %s36_s19, %s68_s20  ;;  %p74_p10 = scmp.lt.s32.totalorder %s68_s20, %s68_s20 }
  0x17   :  { %27 = vst [vmem:[#allocation5] sm:$0xff] %v25_v4  ;;  %28 = vst [vmem:[#allocation5 + $0x8] sm:$0xff] %v26_v5  ;;  %p75_p11 = por %p74_p10, %p73_p9 }
  0x19   :  { %p76_p12 = pnand %p75_p11, %p69_p8 }
  0x1b   :  { %79 = shalt.err (!%p76_p12)
}
  0x1c   :  { %s80_s22 = scalar_lea.hbm %s131_s1, 256 }
  0x1d   :  { %p81_p13 = scmp.ne.s32.totalorder %s131_s1, %s80_s22  ;;  %p84_p0 = scmp.lt.u32.totalorder %s80_s22, %s131_s1 }
  0x1f   :  { %p86_p1 = pnand %p84_p0, %p81_p13 }
  0x21   :  { %89 = shalt.err (!%p86_p1)
}
  0x22   :  { %38 = dma.vmem_to_hbm [thread:$0]  %s36_s19, 256, %s131_s1, [#allocation4]  }
  0x23   :  { %92 = dma.done.wait [#allocation4], 256  }
  0x24   :  { %93 = vsyncadd [#allocation4], 4294967040 }
  0x25   :  { %42 = vsyncpa [#allocation3], 1 }
  0x26   :  { %43 = vsyncpa [#allocation4], 1 }

</bundles_post_ra>
